<compile_context>
chip_gen: v7x
topology: tpu7x:2x2x1
jax: 0.10.0
libtpu: 0.0.40
codegen_flags: <defaults>
</compile_context>

<pallas_src>
import functools

import jax
import jax.numpy as jnp
from jax.experimental import pallas as pl
from jax.experimental.pallas import tpu as pltpu


def _symnets_category_loss_kernel(x_ref, y_ref, lab_ref, out_ref, *, n_rows):
    x = x_ref[...].astype(jnp.float32)            # [TM, C]
    y = y_ref[...].astype(jnp.float32)            # [TM, C]
    labels = lab_ref[...]                         # [TM, 1] int32
    tm, c = x.shape

    # --- tail-row validity (no wrapper-side padding of x / y) --------------
    row0 = pl.program_id(0) * tm
    rows = row0 + jax.lax.broadcasted_iota(jnp.int32, (tm, 1), 0)   # [TM, 1]
    valid = rows < n_rows                                           # bool
    # Zero invalid rows BEFORE exp so garbage in the ragged tail block can
    # never produce NaN/Inf that poisons the partial sum.
    x = jnp.where(valid, x, 0.0)
    y = jnp.where(valid, y, 0.0)

    # --- ConcatSoftmax: softmax over the concatenated (2C) class axis ------
    m = jnp.maximum(jnp.max(x, axis=1, keepdims=True),
                    jnp.max(y, axis=1, keepdims=True))              # [TM, 1]
    ex = jnp.exp(x - m)                                             # [TM, C]
    ey = jnp.exp(y - m)                                             # [TM, C]
    denom = (jnp.sum(ex, axis=1, keepdims=True) +
             jnp.sum(ey, axis=1, keepdims=True))                    # [TM, 1]
    # EUP vrcp + one Newton-Raphson step: ~f32 accuracy, no VALU divide chain.
    inv = pl.reciprocal(denom, approx=True)
    inv = inv * (2.0 - denom * inv)
    p1 = ex * inv                                                   # first half
    p2 = ey * inv                                                   # second half

    # --- one-hot(labels); garbage labels in the tail are harmless (masked) -
    class_idx = jax.lax.broadcasted_iota(jnp.int32, (tm, c), 1)     # [TM, C]
    onehot = (class_idx == labels).astype(jnp.float32)              # [TM, C]

    # --- F.cross_entropy(p, labels): log_softmax over probabilities + NLL --
    # p1/p2 are probabilities in [0, 1] -> exp() cannot overflow, so the
    # usual max-subtraction is skipped.
    lse1 = jnp.log(jnp.sum(jnp.exp(p1), axis=1, keepdims=True))     # [TM, 1]
    lse2 = jnp.log(jnp.sum(jnp.exp(p2), axis=1, keepdims=True))     # [TM, 1]
    # Fused picked-probability reduction:
    #   p1[i,lab] + p2[i,lab] = sum((ex+ey)*onehot, axis=1) * inv
    picked = jnp.sum((ex + ey) * onehot, axis=1, keepdims=True) * inv

    total = (lse1 + lse2 - picked) * valid.astype(jnp.float32)      # [TM, 1]
    partial = jnp.sum(total)                                        # scalar

    # Lane-dense, unmasked (8,128)-shaped store of the per-tile partial sum.
    out_ref[...] = jnp.full(out_ref.shape, partial, dtype=jnp.float32)


@functools.lru_cache(maxsize=None)
def _vmem_budgets():
    """Per-generation (tile_budget_bytes, vmem_limit_bytes)."""
    try:
        phys = int(pltpu.get_tpu_info().vmem_capacity_bytes)
    except Exception:
        phys = 64 * 1024 * 1024   # conservative fallback: assume v7x-sized VMEM
    if phys >= 96 * 1024 * 1024:                  # v5e / v6e: 128 MiB physical
        return 40 * 1024 * 1024, 64 * 1024 * 1024
    return 20 * 1024 * 1024, 40 * 1024 * 1024     # v7x: 64 MiB physical


def _pick_block_rows(n, c, itemsize, tile_budget):
    """Largest sublane-aligned row tile under the per-generation VMEM budget,
    capped at ceil(N/2) rows so the batch axis always has >= 2 grid steps
    (v7x 2-TC sharding; costs only one ~0.35us extra step elsewhere)."""
    align = 16 if itemsize < 4 else 8             # bf16 packs 16 rows/sublane-tile
    # VMEM per tile row: x/y double-buffered input blocks + ~8 f32 temporaries.
    bytes_per_row = 2 * 2 * c * itemsize + 8 * c * 4
    tm = tile_budget // max(bytes_per_row, 1)
    half = (n + 1) // 2
    half_aligned = ((half + align - 1) // align) * align
    tm = min(tm, half_aligned)
    tm = max(align, (tm // align) * align)
    return int(tm)


@functools.partial(jax.jit, static_argnames=("block_rows",))
def symnets_category_loss(x, y, src_labels, block_rows=None):
    """x, y: [N, C] float (f32 or bf16) logits; src_labels: [N] ints in [0, C)."""
    n, c = x.shape
    itemsize = jnp.dtype(x.dtype).itemsize
    align = 16 if itemsize < 4 else 8
    tile_budget, vmem_limit = _vmem_budgets()

    if block_rows is None:
        tm = _pick_block_rows(n, c, itemsize, tile_budget)
    else:
        tm = max(align, (int(block_rows) // align) * align)
    num_tiles = (n + tm - 1) // tm

    labels2d = src_labels.astype(jnp.int32).reshape(n, 1)

    cost = pl.CostEstimate(
        flops=12 * n * c,
        transcendentals=4 * n * c + 3 * n,
        bytes_accessed=2 * n * c * itemsize + n * 4 + num_tiles * 8 * 128 * 4,
    )

    kernel = functools.partial(_symnets_category_loss_kernel, n_rows=n)

    partials = pl.pallas_call(
        kernel,
        out_shape=jax.ShapeDtypeStruct((num_tiles, 8, 128), jnp.float32),
        grid=(num_tiles,),
        in_specs=[
            pl.BlockSpec((tm, c), lambda i: (i, 0)),
            pl.BlockSpec((tm, c), lambda i: (i, 0)),
            pl.BlockSpec((tm, 1), lambda i: (i, 0)),
        ],
        out_specs=pl.BlockSpec((1, 8, 128), lambda i: (i, 0, 0)),
        compiler_params=pltpu.CompilerParams(
            dimension_semantics=("parallel",),    # 2-TC sharding on v7x
            vmem_limit_bytes=vmem_limit,
        ),
        cost_estimate=cost,
    )(x, y, labels2d)

    # Each tile replicated its partial across its (8,128) slab; read one lane.
    return jnp.sum(partials[:, 0, 0]) / jnp.float32(n)


def _reference(x, y, src_labels):
    # Pure-JAX reference mirroring the PyTorch module (for verification).
    z = jnp.concatenate([x, y], axis=1)
    p = jax.nn.softmax(z, axis=1)
    c = x.shape[1]
    p1, p2 = p[:, :c], p[:, c:]

    def ce(logits, labels):
        logp = jax.nn.log_softmax(logits, axis=1)
        nll = -jnp.take_along_axis(logp, labels[:, None], axis=1)[:, 0]
        return jnp.mean(nll)

    return ce(p1, src_labels) + ce(p2, src_labels)


if __name__ == "__main__":
    key = jax.random.PRNGKey(0)
    kx, ky, kl = jax.random.split(key, 3)

    N, C = 24, 32  # small demo: 24 source samples, 32 classes
    x = jax.random.normal(kx, (N, C), dtype=jnp.float32)
    y = jax.random.normal(ky, (N, C), dtype=jnp.float32)
    src_labels = jax.random.randint(kl, (N,), 0, C, dtype=jnp.int32)

    # block_rows=16 -> a 2-step "parallel" grid with a ragged 8-row tail,
    # exercising both the pipelined path and the in-kernel tail-row masking.
    loss = symnets_category_loss(x, y, src_labels, block_rows=16)
    loss = jax.block_until_ready(loss)

    ref = _reference(x, y, src_labels)
    assert jnp.allclose(loss, ref, atol=1e-5, rtol=1e-5), (loss, ref)
    print("KERNEL_OK")
</pallas_src>

<mosaic_0001>
module attributes {stable_mosaic.version = 11 : i64} {
  func.func @_symnets_category_loss_kernel(%arg0: i32, %arg1: memref<16x32xf32, #tpu.memory_space<vmem>>, %arg2: memref<16x32xf32, #tpu.memory_space<vmem>>, %arg3: memref<16x1xi32, #tpu.memory_space<vmem>>, %arg4: memref<1x8x128xf32, #tpu.memory_space<vmem>>) attributes {dimension_semantics = [#tpu.dimension_semantics<parallel>], iteration_bounds = array<i64: 2>, scalar_prefetch = 0 : i64, scratch_operands = 0 : i64, tpu.core_type = #tpu.core_type<tc>, window_params = [{transform_indices = @transform_0, window_bounds = array<i64: 16, 32>}, {transform_indices = @transform_1, window_bounds = array<i64: 16, 32>}, {transform_indices = @transform_2, window_bounds = array<i64: 16, 1>}, {transform_indices = @transform_3, window_bounds = array<i64: 1, 8, 128>}]} {
    %c0 = arith.constant 0 : index
    %c0_0 = arith.constant 0 : index
    %0 = vector.load %arg1[%c0, %c0_0] : memref<16x32xf32, #tpu.memory_space<vmem>>, vector<16x32xf32>
    %c0_1 = arith.constant 0 : index
    %c0_2 = arith.constant 0 : index
    %1 = vector.load %arg2[%c0_1, %c0_2] : memref<16x32xf32, #tpu.memory_space<vmem>>, vector<16x32xf32>
    %c0_3 = arith.constant 0 : index
    %c0_4 = arith.constant 0 : index
    %2 = vector.load %arg3[%c0_3, %c0_4] : memref<16x1xi32, #tpu.memory_space<vmem>>, vector<16x1xi32>
    %c16_i32 = arith.constant 16 : i32
    %3 = arith.muli %arg0, %c16_i32 : i32
    %4 = tpu.iota {dimensions = array<i32: 0>} : vector<16x1xi32>
    %5 = vector.broadcast %3 : i32 to vector<16x1xi32>
    %6 = arith.addi %5, %4 : vector<16x1xi32>
    %c24_i32 = arith.constant 24 : i32
    %7 = vector.broadcast %c24_i32 : i32 to vector<16x1xi32>
    %8 = arith.cmpi slt, %6, %7 : vector<16x1xi32>
    %cst = arith.constant 0.000000e+00 : f32
    %9 = vector.shape_cast %8 : vector<16x1xi1> to vector<16x1xi1>
    %10 = vector.broadcast %9 : vector<16x1xi1> to vector<16x32xi1>
    %11 = vector.broadcast %cst : f32 to vector<16x32xf32>
    %12 = arith.select %10, %0, %11 : vector<16x32xi1>, vector<16x32xf32>
    %cst_5 = arith.constant 0.000000e+00 : f32
    %13 = vector.shape_cast %8 : vector<16x1xi1> to vector<16x1xi1>
    %14 = vector.broadcast %13 : vector<16x1xi1> to vector<16x32xi1>
    %15 = vector.broadcast %cst_5 : f32 to vector<16x32xf32>
    %16 = arith.select %14, %1, %15 : vector<16x32xi1>, vector<16x32xf32>
    %cst_6 = arith.constant dense<0xFF800000> : vector<16xf32>
    %17 = vector.multi_reduction <maximumf>, %12, %cst_6 [1] : vector<16x32xf32> to vector<16xf32>
    %18 = vector.shape_cast %17 : vector<16xf32> to vector<16x1xf32>
    %cst_7 = arith.constant dense<0xFF800000> : vector<16xf32>
    %19 = vector.multi_reduction <maximumf>, %16, %cst_7 [1] : vector<16x32xf32> to vector<16xf32>
    %20 = vector.shape_cast %19 : vector<16xf32> to vector<16x1xf32>
    %21 = arith.maximumf %18, %20 : vector<16x1xf32>
    %22 = vector.broadcast %21 : vector<16x1xf32> to vector<16x32xf32>
    %23 = arith.subf %12, %22 : vector<16x32xf32>
    %24 = math.exp %23 : vector<16x32xf32>
    %25 = vector.broadcast %21 : vector<16x1xf32> to vector<16x32xf32>
    %26 = arith.subf %16, %25 : vector<16x32xf32>
    %27 = math.exp %26 : vector<16x32xf32>
    %cst_8 = arith.constant dense<0.000000e+00> : vector<16xf32>
    %28 = vector.multi_reduction <add>, %24, %cst_8 [1] : vector<16x32xf32> to vector<16xf32>
    %29 = vector.shape_cast %28 : vector<16xf32> to vector<16x1xf32>
    %cst_9 = arith.constant dense<0.000000e+00> : vector<16xf32>
    %30 = vector.multi_reduction <add>, %27, %cst_9 [1] : vector<16x32xf32> to vector<16xf32>
    %31 = vector.shape_cast %30 : vector<16xf32> to vector<16x1xf32>
    %32 = arith.addf %29, %31 : vector<16x1xf32>
    %33 = tpu.reciprocal %32 {approx = true} : vector<16x1xf32> -> vector<16x1xf32>
    %34 = arith.mulf %32, %33 : vector<16x1xf32>
    %cst_10 = arith.constant 2.000000e+00 : f32
    %35 = vector.broadcast %cst_10 : f32 to vector<16x1xf32>
    %36 = arith.subf %35, %34 : vector<16x1xf32>
    %37 = arith.mulf %33, %36 : vector<16x1xf32>
    %38 = vector.broadcast %37 : vector<16x1xf32> to vector<16x32xf32>
    %39 = arith.mulf %24, %38 : vector<16x32xf32>
    %40 = vector.broadcast %37 : vector<16x1xf32> to vector<16x32xf32>
    %41 = arith.mulf %27, %40 : vector<16x32xf32>
    %42 = tpu.iota {dimensions = array<i32: 1>} : vector<16x32xi32>
    %43 = vector.broadcast %2 : vector<16x1xi32> to vector<16x32xi32>
    %44 = arith.cmpi eq, %42, %43 : vector<16x32xi32>
    %45 = arith.extui %44 : vector<16x32xi1> to vector<16x32xi32>
    %46 = arith.sitofp %45 : vector<16x32xi32> to vector<16x32xf32>
    %47 = math.exp %39 : vector<16x32xf32>
    %cst_11 = arith.constant dense<0.000000e+00> : vector<16xf32>
    %48 = vector.multi_reduction <add>, %47, %cst_11 [1] : vector<16x32xf32> to vector<16xf32>
    %49 = vector.shape_cast %48 : vector<16xf32> to vector<16x1xf32>
    %50 = math.log %49 : vector<16x1xf32>
    %51 = math.exp %41 : vector<16x32xf32>
    %cst_12 = arith.constant dense<0.000000e+00> : vector<16xf32>
    %52 = vector.multi_reduction <add>, %51, %cst_12 [1] : vector<16x32xf32> to vector<16xf32>
    %53 = vector.shape_cast %52 : vector<16xf32> to vector<16x1xf32>
    %54 = math.log %53 : vector<16x1xf32>
    %55 = arith.addf %24, %27 : vector<16x32xf32>
    %56 = arith.mulf %55, %46 : vector<16x32xf32>
    %cst_13 = arith.constant dense<0.000000e+00> : vector<16xf32>
    %57 = vector.multi_reduction <add>, %56, %cst_13 [1] : vector<16x32xf32> to vector<16xf32>
    %58 = vector.shape_cast %57 : vector<16xf32> to vector<16x1xf32>
    %59 = arith.mulf %58, %37 : vector<16x1xf32>
    %60 = arith.addf %50, %54 : vector<16x1xf32>
    %61 = arith.subf %60, %59 : vector<16x1xf32>
    %62 = arith.extui %8 : vector<16x1xi1> to vector<16x1xi32>
    %63 = arith.sitofp %62 : vector<16x1xi32> to vector<16x1xf32>
    %64 = arith.mulf %61, %63 : vector<16x1xf32>
    %65 = vector.shape_cast %64 : vector<16x1xf32> to vector<1x16x1xf32>
    %cst_14 = arith.constant dense<0.000000e+00> : vector<1xf32>
    %66 = vector.multi_reduction <add>, %65, %cst_14 [1, 2] : vector<1x16x1xf32> to vector<1xf32>
    %67 = vector.shape_cast %66 : vector<1xf32> to vector<1x1x1xf32>
    %68 = vector.extract %67[0, 0, 0] : f32 from vector<1x1x1xf32>
    %69 = vector.broadcast %68 : f32 to vector<1x8x128xf32>
    %c0_15 = arith.constant 0 : index
    %c0_16 = arith.constant 0 : index
    %c0_17 = arith.constant 0 : index
    %70 = vector.load %arg4[%c0_15, %c0_16, %c0_17] : memref<1x8x128xf32, #tpu.memory_space<vmem>>, vector<1x8x128xf32>
    tpu.vector_store %arg4[%c0_15, %c0_16, %c0_17], %69 {strides = array<i32>} : memref<1x8x128xf32, #tpu.memory_space<vmem>>, vector<1x8x128xf32>,
    return
  }
  func.func @transform_0(%arg0: i32) -> (i32, i32) {
    %c0_i32 = arith.constant 0 : i32
    %c0_i32_0 = arith.constant 0 : i32
    return %arg0, %c0_i32 : i32, i32
  }
  func.func @transform_1(%arg0: i32) -> (i32, i32) {
    %c0_i32 = arith.constant 0 : i32
    %c0_i32_0 = arith.constant 0 : i32
    return %arg0, %c0_i32 : i32, i32
  }
  func.func @transform_2(%arg0: i32) -> (i32, i32) {
    %c0_i32 = arith.constant 0 : i32
    %c0_i32_0 = arith.constant 0 : i32
    return %arg0, %c0_i32 : i32, i32
  }
  func.func @transform_3(%arg0: i32) -> (i32, i32, i32) {
    %c0_i32 = arith.constant 0 : i32
    %c0_i32_0 = arith.constant 0 : i32
    %c0_i32_1 = arith.constant 0 : i32
    return %arg0, %c0_i32, %c0_i32_0 : i32, i32, i32
  }
}

</mosaic_0001>

<bundles_post_ra>
// kernel: symnets_category_loss.1
= control target key start
LH: loop header
LB: loop body
LE: loop exit
PB: predicated region body
PF: predicated region fallthrough
CT: control target
= control target key end

     0   :  { %8 = vsyncpa [#allocation3], 0  ;;  %s870_s0 = inlined_call_operand.vmem [shape: f32[24,32], index: 0, kind: input, shape index: {}]   ;;  %s871_s1 = inlined_call_operand.hbm [shape: f32[24,32], index: 1, kind: input, shape index: {}]   ;;  %s872_s2 = inlined_call_operand.vmem [shape: s32[24,1], index: 2, kind: input, shape index: {}]   ;;  %s873_s3 = inlined_call_operand.vmem [shape: f32[2,8,128], index: 3, kind: output, shape index: {}]  }
   0x1   :  { %10 = vsyncpa [#allocation3 + $0x1], 0  ;;  %s709_s12 = smov 0   ;;  %s711_s13 = smov 0  }
   0x2   :  { %s713_s14 = smov 0   ;;  %s715_s15 = smov 0  }
   0x3 LB: > { %s728_s16 = sadd.s32 4294967295, %s682_s15   ;;  %s731_s17 = sadd.s32 1, %s682_s15   ;;  %s682_s15 = sphi %s715_s15, %s878_s15   ;;  %s678_s14 = sphi %s713_s14, %s877_s14   ;;  %s674_s13 = sphi %s711_s13, %s876_s13   ;;  %s670_s12 = sphi %s709_s12, %s875_s12  }
   0x4   : > { %s46_s18 = ssub.s32 %s682_s15, %s731_s17  ;;  %s49_s19 = sadd.s32 1, %s678_s14 }
   0x5   : > { %p47_p0 = scmp.eq.s32.totalorder %s46_s18, 0  ;;  %p56_p1 = scmp.ne.s32.totalorder %s678_s14, %s674_s13 }
   0x6   : > { %p57_p2 = scmp.eq.s32.totalorder %s682_s15, 0  ;;  %p62_p3 = scmp.ne.s32.totalorder %s674_s13, %s670_s12 }
   0x7   : > { %s741_s20 = scalar_select %p47_p0, %s678_s14, %s49_s19  }
   0x8   : > { %p58_p4 = por %p57_p2, %p56_p1  ;;  %p63_p5 = scmp.eq.s32.totalorder %s728_s16, 0 }
   0x9   : > { %p528_p7 = scmp.ge.s32.totalorder %s682_s15, 2 }
   0xa   : > { %p744_p6 = por %p63_p5, %p62_p3 }
   0xb   : > { %134 = sbr.rel (%p528_p7) target bundleno = 53 (0x35), region = 16 }
  0x12   : > { %154 = sbr.rel (!%p58_p4) target bundleno = 53 (0x35), region = 24  ;;  %s155_s22 = sand.u32 (%p58_p4), 1, %s678_s14  }
  0x13   : > { %s530_s23 = sshll.u32 (%p58_p4), %s682_s15, 1  ;;  %s529_s24 = sshll.u32 (%p58_p4), %s155_s22, 4 }
  0x14   : > { %s161_s25 = ssub.s32 (%p58_p4), 3, %s530_s23  ;;  %s754_s28 = scalar_lea.sflag (%p58_p4), [#allocation3], %s155_s22 }
  0x15   : > { %p162_p8 = scmp.lt.s32.totalorder (%p58_p4), %s161_s25, 2  ;;  %s159_s29 = scalar_lea.vmem (%p58_p4), [#allocation2], %s529_s24 }
  0x19   : > { %s880_s25 = smov (!%p162_p8, %s161_s25), 2 }
  0x1a   : > { %s751_s26 = sshll.u32 %s880_s25, 7 }
  0x1b   : > { %s166_s27 = ssub.s32 256, %s751_s26 }
  0x1c   : > { %167 = vsyncadd %s754_s28, %s166_s27  ;;  %p532_p9 = scmp.ne.s32.totalorder %s751_s26, 0  ;;  %s550_s30 = sshll.u32 %s682_s15, 8 }
  0x1d   : > { %s762_s6 = scalar_lea.hbm %s871_s1, %s550_s30  ;;  %s172_s7 = sshll.u32 %s159_s29, 4  ;;  %s764_s7 = int_to_ptr.vmem [resolvable:$true] %s172_s7 }
  0x1e   : > { %s620_s8 = scalar_lea.hbm %s762_s6, %s751_s26  ;;  %s624_s11 = scalar_lea.hbm %s871_s1, 384 }
  0x1f   : > { %p621_p10 = scmp.ne.s32.totalorder %s762_s6, %s620_s8  ;;  %p625_p13 = scmp.lt.u32.totalorder %s762_s6, %s871_s1 }
  0x20   : > { %p626_p0 = scmp.lt.u32.totalorder %s624_s11, %s620_s8  ;;  %p628_p2 = scmp.lt.u32.totalorder %s620_s8, %s762_s6 }
  0x21   : > { %p622_p11 = pnand %p621_p10, %p532_p9 }
  0x22   : > { %p627_p1 = por %p626_p0, %p625_p13 }
  0x23   : > { %p623_p12 = pneg %p622_p11 }
  0x24   : > { %p629_p3 = por %p628_p2, %p627_p1 }
  0x26   : > { %p630_p4 = pnand %p629_p3, %p623_p12 }
  0x28   : > { %633 = shalt.err (!%p630_p4)
}
  0x29   : > { %s634_s19 = scalar_lea.vmem %s764_s7, %s751_s26  ;;  %s684_s22 = smov [#allocation2]  }
  0x2a   : > { %p635_p5 = scmp.ne.s32.totalorder %s764_s7, %s634_s19  ;;  %s638_s23 = sshll.u32 %s684_s22, 4  ;;  %s639_s23 = int_to_ptr.vmem [resolvable:$false] %s638_s23 }
  0x2b   : > { %s640_s24 = scalar_lea.vmem %s639_s23, 512  ;;  %p641_p10 = scmp.lt.s32.totalorder %s764_s7, %s639_s23 }
  0x2c   : > { %p636_p7 = pnand %p635_p5, %p532_p9  ;;  %p642_p11 = scmp.lt.s32.totalorder %s640_s24, %s634_s19 }
  0x2e   : > { %p637_p8 = pneg %p636_p7  ;;  %p643_p13 = por %p642_p11, %p641_p10 }
  0x30   : > { %p644_p0 = pnand %p643_p13, %p637_p8 }
  0x32   : > { %647 = shalt.err (!%p644_p0)
}
  0x33   : > { %s685_s25 = smov 128   ;;  %s686_s27 = smov 8  }
  0x34   : > { %178 = dma.hbm_to_vmem [thread:$0]  (%p532_p9), %s762_s6, %s751_s26, %s764_s7, %s754_s28, %s685_s25, %s685_s25, %s686_s27  }
  0x35 PF: > { %p536_p12 = scmp.ge.s32.totalorder %s682_s15, 1  ;;  %p197_p1 = scmp.lt.s32.totalorder %s682_s15, 3 }
  0x37   : > { %p198_p2 = pnand %p536_p12, %p197_p1 }
  0x38   : > { %s203_s29 = sand.u32 (!%p198_p2), 1, %s674_s13  }
  0x39   : > { %201 = sbr.rel (%p198_p2) target bundleno = 793 (0x319), region = 32  ;;  %s537_s30 = sshll.u32 (!%p198_p2), %s203_s29, 4 }
  0x3a   : > { %s204_s4 = scalar_lea.sflag (!%p198_p2), [#allocation3], %s203_s29  ;;  %s207_s5 = scalar_lea.vmem (!%p198_p2), [#allocation2], %s537_s30 }
  0x40   : > { %665 = dma.done.wait (%p744_p6), %s204_s4, 256  }
  0x41   : > { %667 = vsyncadd (%p744_p6), %s204_s4, 4294967040  ;;  %s543_s26 = sshll.u32 %s728_s16, 4  ;;  %v291_v0 = vlaneseq  ;;  %s538_s28 = sshll.u32 %s728_s16, 1  ;;  %vm307_vm1 = vcmask 261120   ;;  %v286_v6 = vld [vmem:[%s207_s5] sm:$0xff]  ;;  %v287_v8 = vld [vmem:[%s207_s5 + $0x8] sm:$0xff] }
  0x42   : > { %v294_v1 = vstv %s543_s26  ;;  %p252_p9 = scmp.lt.s32.totalorder %s538_s28, 2  ;;  %v687_v18 = vmov 0   ;;  %vm422_vm5 = vcmask 7168   ;;  %p280_p6 = scmp.lt.s32.totalorder %s728_s16, 1 }
  0x43   : > { %v292_v2 = vshrl.u32 %v291_v0, 7  ;;  %591 = vset.pattern.permute.xlu1 %v687_v18  ;;  %590 = vset.pattern.permute.xlu0 %v687_v18 }
  0x44   : > { %s882_s28 = smov (!%p252_p9, %s538_s28), 2  ;;  %s884_s16 = smov (!%p280_p6, %s728_s16), 1 }
  0x45   : > { %v803_v3 = vadd.s32 %v294_v1, %v292_v2  ;;  %v293_v4 = vadd.s32 8, %v292_v2  ;;  %s539_s15 = sshll.u32 %s882_s28, 3  ;;  %v361_v2 = vand.u32 127, %v291_v0  ;;  %s542_s11 = sshll.u32 %s884_s16, 3 }
  0x46   : > { %s255_s7 = scalar_lea.vmem %s870_s0, %s539_s15  ;;  %s274_s10 = scalar_lea.vmem %s872_s2, %s539_s15 }
  0x47   : > { %vm297_vm0 = vcmp.lt.s32.totalorder %v803_v3, 24  ;;  %v812_v5 = vadd.s32 %v294_v1, %v293_v4  ;;  %v284_v7 = vld [vmem:[%s255_s7] sm:$0xff]  ;;  %v285_v11 = vld [vmem:[%s255_s7 + $0x8] sm:$0xff]  ;;  %s283_s19 = scalar_lea.vmem %s873_s3, %s542_s11 }
  0x48   : > { %v305_v9 = vsel %vm297_vm0, %v286_v6, 0.0  ;;  %v303_v10 = vsel %vm297_vm0, %v284_v7, 0.0  ;;  %v289_v41 = vld [vmem:[%s274_s10 + $0x8] sm:$0xff]  ;;  %v288_v42 = vld [vmem:[%s274_s10] sm:$0xff] }
  0x49   : > { %vm298_vm2 = vcmp.lt.s32.totalorder %v812_v5, 24  ;;  %v314_v12 = vsel %vm307_vm1, %v305_v9, -inf  ;;  %v308_v13 = vsel %vm307_vm1, %v303_v10, -inf }
  0x4a   : > { %v306_v14 = vsel %vm298_vm2, %v287_v8, 0.0  ;;  %v304_v15 = vsel %vm298_vm2, %v285_v11, 0.0  ;;  %315 = vmax.xlane.f32.xlu1 %v314_v12  ;;  %309 = vmax.xlane.f32.xlu0 %v308_v13 }
  0x4b   : > { %v317_v16 = vsel %vm307_vm1, %v306_v14, -inf  ;;  %v311_v17 = vsel %vm307_vm1, %v304_v15, -inf }
  0x4e   : > { %318 = vmax.xlane.f32.xlu1 %v317_v16  ;;  %312 = vmax.xlane.f32.xlu0 %v311_v17 }
  0xd7   : > { %v316_v19 = vpop.xlane.xlu1 %315  ;;  %v310_v20 = vpop.xlane.xlu0 %309 }
  0xd8   : > { %v320_v21 = vmax.f32 %v310_v20, %v316_v19 }
  0xda   : > { %v322_v22 = vsub.f32 %v303_v10, %v320_v21  ;;  %v328_v23 = vsub.f32 %v305_v9, %v320_v21 }
  0xdb   : > { %v319_v24 = vpop.xlane.xlu1 %318  ;;  %v313_v25 = vpop.xlane.xlu0 %312 }
  0xdc   : > { %v324_v26 = vmul.f32 1.442695, %v322_v22  ;;  %v330_v27 = vmul.f32 1.442695, %v328_v23  ;;  %v321_v28 = vmax.f32 %v313_v25, %v319_v24 }
  0xde   : > { %592 = vpow2.f32 %v324_v26  ;;  %v323_v29 = vsub.f32 %v304_v15, %v321_v28  ;;  %v329_v30 = vsub.f32 %v306_v14, %v321_v28  ;;  %v688_v14 = vmov 0.0  }
  0xdf   : > { %594 = vpow2.f32 %v330_v27 }
  0xe0   : > { %v326_v31 = vmul.f32 1.442695, %v323_v29  ;;  %v332_v32 = vmul.f32 1.442695, %v329_v30 }
  0xe2   : > { %596 = vpow2.f32 %v326_v31 }
  0xe3   : > { %598 = vpow2.f32 %v332_v32 }
  0xe8   : > { %v593_v33 = vpop.eup %592 }
  0xe9   : > { %v334_v34 = vsel %vm307_vm1, %v593_v33, 0.0  ;;  %v595_v35 = vpop.eup %594 }
  0xea   : > { %335 = vadd.xlane.f32.xlu0 %v334_v34  ;;  %v340_v38 = vsel %vm307_vm1, %v595_v35, 0.0  ;;  %v402_v0 = vadd.f32 %v595_v35, %v593_v33 }
  0xec   : > { %v828_v36 = vpop.eup %596 }
  0xed   : > { %v599_v37 = vpop.eup %598  ;;  %v337_v39 = vsel %vm307_vm1, %v828_v36, 0.0 }
  0xee   : > { %341 = vadd.xlane.f32.xlu0 %v340_v38  ;;  %338 = vadd.xlane.f32.xlu1 %v337_v39  ;;  %v343_v40 = vsel %vm307_vm1, %v599_v37, 0.0  ;;  %v403_v19 = vadd.f32 %v599_v37, %v828_v36 }
  0xf2   : > { %344 = vadd.xlane.f32.xlu1 %v343_v40  ;;  %v546_v40 = vsel %vm297_vm0, 1.0, %v688_v14 }
 0x103   : > { %366 = vperm.xlu1 %591, %v289_v41  }
 0x104   : > { %363 = vperm.xlu0 %590, %v288_v42  }
 0x177   : > { %v336_v43 = vpop.xlane.xlu0 %335 }
 0x17b   : > { %v339_v44 = vpop.xlane.xlu1 %338  ;;  %v342_v45 = vpop.xlane.xlu0 %341 }
 0x17c   : > { %v346_v46 = vadd.f32 %v342_v45, %v336_v43  ;;  %v547_v43 = vsel %vm298_vm2, 1.0, %v688_v14 }
 0x17e   : > { %600 = vrcp.f32 %v346_v46 }
 0x17f   : > { %v345_v47 = vpop.xlane.xlu1 %344 }
 0x180   : > { %v347_v48 = vadd.f32 %v345_v47, %v339_v44 }
 0x182   : > { %602 = vrcp.f32 %v347_v48 }
 0x183   : > { %v364_v6 = vpop.permute.xlu0 %363  ;;  %v367_v10 = vpop.permute.xlu1 %366 }
 0x184   : > { %vm368_vm3 = vcmp.eq.s32.totalorder %v361_v2, %v364_v6  ;;  %vm369_vm4 = vcmp.eq.s32.totalorder %v361_v2, %v367_v10 }
 0x185   : > { %v544_v15 = vsel %vm368_vm3, 1.0, %v688_v14  ;;  %v545_v18 = vsel %vm369_vm4, 1.0, %v688_v14 }
 0x186   : > { %v404_v17 = vmul.f32 %v544_v15, %v402_v0  ;;  %v405_v21 = vmul.f32 %v545_v18, %v403_v19 }
 0x188   : > { %v601_v49 = vpop.eup %600  ;;  %v406_v20 = vsel %vm307_vm1, %v404_v17, 0.0  ;;  %v409_v22 = vsel %vm307_vm1, %v405_v21, 0.0 }
 0x189   : > { %v350_v50 = vmul.f32 %v601_v49, %v346_v46 }
 0x18b   : > { %v352_v51 = vsub.f32 2.0, %v350_v50 }
 0x18c   : > { %v603_v52 = vpop.eup %602 }
 0x18d   : > { %v354_v53 = vmul.f32 %v601_v49, %v352_v51  ;;  %v351_v54 = vmul.f32 %v603_v52, %v347_v48 }
 0x18f   : > { %v356_v55 = vmul.f32 %v593_v33, %v354_v53  ;;  %v358_v56 = vmul.f32 %v595_v35, %v354_v53  ;;  %v353_v57 = vsub.f32 2.0, %v351_v54 }
 0x191   : > { %v374_v58 = vmul.f32 1.442695, %v356_v55  ;;  %v388_v59 = vmul.f32 1.442695, %v358_v56  ;;  %v355_v60 = vmul.f32 %v603_v52, %v353_v57 }
 0x193   : > { %604 = vpow2.f32 %v374_v58  ;;  %v357_v61 = vmul.f32 %v828_v36, %v355_v60  ;;  %v359_v62 = vmul.f32 %v599_v37, %v355_v60 }
 0x194   : > { %606 = vpow2.f32 %v388_v59 }
 0x195   : > { %v376_v63 = vmul.f32 1.442695, %v357_v61  ;;  %v390_v1 = vmul.f32 1.442695, %v359_v62 }
 0x197   : > { %608 = vpow2.f32 %v376_v63 }
 0x198   : > { %610 = vpow2.f32 %v390_v1 }
 0x19d   : > { %v605_v4 = vpop.eup %604 }
 0x19e   : > { %v378_v7 = vsel %vm307_vm1, %v605_v4, 0.0  ;;  %v607_v8 = vpop.eup %606 }
 0x19f   : > { %379 = vadd.xlane.f32.xlu1 %v378_v7  ;;  %v392_v12 = vsel %vm307_vm1, %v607_v8, 0.0 }
 0x1a1   : > { %v609_v9 = vpop.eup %608 }
 0x1a2   : > { %v381_v11 = vsel %vm307_vm1, %v609_v9, 0.0  ;;  %v611_v13 = vpop.eup %610 }
 0x1a3   : > { %382 = vadd.xlane.f32.xlu0 %v381_v11  ;;  %393 = vadd.xlane.f32.xlu1 %v392_v12  ;;  %v395_v16 = vsel %vm307_vm1, %v611_v13, 0.0 }
 0x1a7   : > { %396 = vadd.xlane.f32.xlu1 %v395_v16 }
 0x1ab   : > { %407 = vadd.xlane.f32.xlu1 %v406_v20 }
 0x1af   : > { %410 = vadd.xlane.f32.xlu1 %v409_v22 }
 0x22c   : > { %v380_v23 = vpop.xlane.xlu1 %379 }
 0x22d   : > { %612 = vlog2.f32 %v380_v23 }
 0x230   : > { %v394_v24 = vpop.xlane.xlu1 %393  ;;  %v383_v25 = vpop.xlane.xlu0 %382 }
 0x231   : > { %614 = vlog2.f32 %v394_v24 }
 0x232   : > { %616 = vlog2.f32 %v383_v25 }
 0x234   : > { %v397_v26 = vpop.xlane.xlu1 %396 }
 0x235   : > { %618 = vlog2.f32 %v397_v26 }
 0x237   : > { %v613_v27 = vpop.eup %612 }
 0x238   : > { %v408_v28 = vpop.xlane.xlu1 %407  ;;  %v385_v30 = vmul.f32 0.6931472, %v613_v27 }
 0x239   : > { %v412_v34 = vmul.f32 %v408_v28, %v354_v53 }
 0x23b   : > { %v615_v29 = vpop.eup %614 }
 0x23c   : > { %v399_v31 = vmul.f32 0.6931472, %v615_v29  ;;  %v617_v32 = vpop.eup %616  ;;  %v411_v36 = vpop.xlane.xlu1 %410 }
 0x23d   : > { %v387_v37 = vmul.f32 0.6931472, %v617_v32  ;;  %v413_v41 = vmul.f32 %v411_v36, %v355_v60 }
 0x23e   : > { %v414_v33 = vadd.f32 %v399_v31, %v385_v30 }
 0x23f   : > { %v619_v35 = vpop.eup %618 }
 0x240   : > { %v401_v38 = vmul.f32 0.6931472, %v619_v35  ;;  %v416_v39 = vsub.f32 %v414_v33, %v412_v34 }
 0x242   : > { %v415_v42 = vadd.f32 %v401_v38, %v387_v37  ;;  %v420_v45 = vmul.f32 %v546_v40, %v416_v39 }
 0x244   : > { %v417_v44 = vsub.f32 %v415_v42, %v413_v41  ;;  %v423_v47 = vsel %vm422_vm5, %v420_v45, 0.0 }
 0x246   : > { %v421_v46 = vmul.f32 %v547_v43, %v417_v44 }
 0x248   : > { %v424_v48 = vsel %vm422_vm5, %v421_v46, 0.0 }
 0x249   : > { %v425_v49 = vadd.f32 %v424_v48, %v423_v47 }
 0x24b   : > { %426 = vadd.xlane.f32.xlu1 %v425_v49 }
 0x2d8   : > { %v427_v50 = vpop.xlane.xlu1 %426 }
 0x2d9   : > { %v428_v51 = vrot.slane %v427_v50, 4 }
 0x2db   : > { %v429_v52 = vadd.f32 %v428_v51, %v427_v50 }
 0x2dd   : > { %v430_v3 = vrot.slane %v429_v52, 2 }
 0x2df   : > { %v431_v53 = vadd.f32 %v430_v3, %v429_v52 }
 0x2e1   : > { %v432_v54 = vrot.slane %v431_v53, 1 }
 0x2e3   : > { %v433_v55 = vadd.f32 %v432_v54, %v431_v53 }
 0x2e5   : > { %551 = vpush %v433_v55 }
 0x316   : > { %s552_s22 = spop %551 }
 0x317   : > { %v435_v5 = vstv %s552_s22 }
 0x318   : > { %436 = vst [vmem:[%s283_s19] sm:$0xff] %v435_v5 }
 0x319 PF: > { %p13_p3 = scmp.ge.s32.totalorder %s731_s17, 4   ;;  %s875_s12 = smov %s674_s13 }
 0x31a   : > { %s876_s13 = smov %s678_s14  ;;  %s877_s14 = smov %s741_s20 }
 0x31b   : > { %s878_s15 = smov %s731_s17  ;;  %15 = sbr.rel (!%p13_p3) target bundleno = 3 (0x3), region = 78 }
 0x322   :  { %456 = vsyncpa [#allocation3], 1 }
 0x323   :  { %458 = vsyncpa [#allocation3 + $0x1], 1 }

</bundles_post_ra>
